<compile_context>
chip_gen: v7x
topology: tpu7x:2x2x1
jax: 0.10.0
libtpu: 0.0.40
codegen_flags: <defaults>
</compile_context>

<pallas_src>
import functools
import math

import jax
import jax.numpy as jnp
from jax import lax
from jax.experimental import pallas as pl
from jax.experimental.pallas import tpu as pltpu


def _layernorm_fixed(x, eps=1e-5):
    """LayerNorm with fixed gamma=1, beta=0 (biased variance, eps=1e-5)."""
    n = x.shape[-1]
    s1 = jnp.sum(x, axis=-1, keepdims=True)
    s2 = jnp.sum(x * x, axis=-1, keepdims=True)
    mean = s1 * (1.0 / n)
    var = jnp.maximum(s2 * (1.0 / n) - mean * mean, 0.0)
    return (x - mean) * lax.rsqrt(var + eps)


# ----------------------------- Pallas kernel --------------------------------
def wann_block_kernel(x_ref, wcomb_ref, w2_ref, bias_ref, o_ref, *,
                      num_heads, shared_weight):
    """One batch tile per grid step: x_ref block is (B_TILE, S, E)."""
    BT, S, E = x_ref.shape
    M = BT * S
    H = num_heads
    D = E // H
    sw = float(shared_weight)
    inv_sqrt_d = 1.0 / math.sqrt(D)

    # Residual / elementwise path in f32; MXU inputs in bf16 (binary masks exact).
    x_f32 = x_ref[...].reshape(M, E).astype(jnp.float32)   # leading-dim merge only
    x_bf = x_f32.astype(jnp.bfloat16)

    w = wcomb_ref[...]                       # (E, 4E+hidden) bf16 binary masks
    w_qkv = w[:, :3 * E]                     # (E, 3E)
    w_o = w[:, 3 * E:4 * E]                  # (E, E)
    w_1 = w[:, 4 * E:]                       # (E, hidden)

    # ---- fused QKV projection, batch folded into M ------------------------
    qkv = jnp.dot(x_bf, w_qkv, preferred_element_type=jnp.float32)   # (M, 3E) f32
    if sw != 1.0:
        qkv = qkv * sw                        # shared_weight applied in f32
    qkv = qkv.reshape(BT, S, 3 * E)           # leading-dim split only

    bias = bias_ref[...]                      # (S, S) additive causal mask (0 / -1e30)

    # ---- causal MHA: per-head static lane slices, no head-dim relayouts ---
    ctx_heads = []
    for h in range(H):
        q_h = (qkv[:, :, h * D:(h + 1) * D] * inv_sqrt_d).astype(jnp.bfloat16)
        k_h = qkv[:, :, E + h * D:E + (h + 1) * D].astype(jnp.bfloat16)
        v_h = qkv[:, :, 2 * E + h * D:2 * E + (h + 1) * D].astype(jnp.bfloat16)

        s_h = jnp.einsum('bqd,bkd->bqk', q_h, k_h,
                         preferred_element_type=jnp.float32) + bias[None]   # (BT,S,S)
        m = jnp.max(s_h, axis=-1, keepdims=True)
        p = jnp.exp(s_h - m)
        l = jnp.sum(p, axis=-1, keepdims=True)
        attn = p * pl.reciprocal(l, approx=True)          # EUP, off the VALU
        ctx_heads.append(
            jnp.einsum('bqk,bkd->bqd', attn.astype(jnp.bfloat16), v_h,
                       preferred_element_type=jnp.float32))               # (BT,S,D)

    ctx = jnp.concatenate(ctx_heads, axis=-1).reshape(M, E)               # (M, E) f32

    attn_out = jnp.dot(ctx.astype(jnp.bfloat16), w_o,
                       preferred_element_type=jnp.float32)                # (M, E)
    if sw != 1.0:
        attn_out = attn_out * sw
    x1 = _layernorm_fixed(x_f32 + attn_out)

    # ---- feedforward: E -> hidden -> ReLU -> E ------------------------------
    hdn = jnp.dot(x1.astype(jnp.bfloat16), w_1,
                  preferred_element_type=jnp.float32)                     # (M, hidden)
    if sw != 1.0:
        hdn = hdn * sw
    hdn = jnp.maximum(hdn, 0.0)                                           # RELU
    ff = jnp.dot(hdn.astype(jnp.bfloat16), w2_ref[...],
                 preferred_element_type=jnp.float32)                      # (M, E)
    if sw != 1.0:
        ff = ff * sw

    x2 = _layernorm_fixed(x1 + ff)
    o_ref[...] = x2.reshape(BT, S, E).astype(o_ref.dtype)


# -------------------------- host-side weight prep ---------------------------
def _prepare_weights(params):
    """Transpose masks to (in, out); pack all E-leading weights into one array.

    Masks stay pure {0, 1} in bf16 (exact).  shared_weight and 1/sqrt(D) are
    applied post-matmul in f32 inside the kernel, so no weight quantization
    beyond the exact binary values.
    """
    wq_t = params['wq'].T.astype(jnp.bfloat16)     # (E, E)
    wk_t = params['wk'].T.astype(jnp.bfloat16)     # (E, E)
    wv_t = params['wv'].T.astype(jnp.bfloat16)     # (E, E)
    wo_t = params['wo'].T.astype(jnp.bfloat16)     # (E, E)
    w1_t = params['w1'].T.astype(jnp.bfloat16)     # (E, hidden)
    w2_t = params['w2'].T.astype(jnp.bfloat16)     # (hidden, E)
    wcomb = jnp.concatenate([wq_t, wk_t, wv_t, wo_t, w1_t], axis=1)   # (E, 4E+hidden)
    return wcomb, w2_t


def wann_transformer_block(x, params, shared_weight=1.0, *, num_heads):
    """x: (B, S, E) float32. params: dict of binary connection masks (out, in)."""
    B, S, E = x.shape
    hidden = params['w1'].shape[0]
    wcomb, w2 = _prepare_weights(params)

    # Fold batch into the matmul M dim but keep >= 2 grid steps when possible so
    # v7x's second TensorCore gets work ("parallel" axis).  On v5e/v6e a small
    # grid just means fewer pipeline prologues.
    b_tile = B // 2 if (B >= 2 and B % 2 == 0) else 1
    grid = (B // b_tile,)

    # Precomputed additive causal mask (grid-invariant input).
    causal_bias = jnp.where(jnp.tril(jnp.ones((S, S), dtype=bool)),
                            0.0, -1e30).astype(jnp.float32)

    kernel = functools.partial(wann_block_kernel, num_heads=num_heads,
                               shared_weight=float(shared_weight))
    return pl.pallas_call(
        kernel,
        out_shape=jax.ShapeDtypeStruct(x.shape, x.dtype),
        grid_spec=pltpu.PrefetchScalarGridSpec(
            num_scalar_prefetch=0,
            grid=grid,
            in_specs=[
                pl.BlockSpec((b_tile, S, E), lambda b: (b, 0, 0)),        # x (batch tile)
                pl.BlockSpec((E, 4 * E + hidden), lambda b: (0, 0)),      # [wq|wk|wv|wo|w1]
                pl.BlockSpec((hidden, E), lambda b: (0, 0)),              # w2
                pl.BlockSpec((S, S), lambda b: (0, 0)),                   # causal bias
            ],
            out_specs=pl.BlockSpec((b_tile, S, E), lambda b: (b, 0, 0)),
        ),
        compiler_params=pltpu.CompilerParams(
            dimension_semantics=("parallel",),       # megacore sharding on v7x
        ),
    )(x, wcomb, w2, causal_bias)


# -------------------------- pure-JAX reference ------------------------------
# Mirrors the kernel's mixed precision (bf16 MXU inputs, f32 accumulation,
# f32 post-matmul scaling, f32 elementwise math) so the comparison isolates the
# Pallas lowering.  Softmax here is exact (kernel uses approx EUP reciprocal).
def reference_block(x, params, shared_weight, num_heads):
    B, S, E = x.shape
    H, D = num_heads, E // num_heads
    sw = float(shared_weight)
    wcomb, w2 = _prepare_weights(params)
    w_qkv = wcomb[:, :3 * E]
    w_o = wcomb[:, 3 * E:4 * E]
    w_1 = wcomb[:, 4 * E:]

    x_f32 = x.astype(jnp.float32)
    x_bf = x_f32.astype(jnp.bfloat16)

    qkv = jnp.einsum('bse,ef->bsf', x_bf, w_qkv,
                     preferred_element_type=jnp.float32) * sw
    q = (qkv[..., :E] * (1.0 / math.sqrt(D))).astype(jnp.bfloat16).reshape(B, S, H, D)
    k = qkv[..., E:2 * E].astype(jnp.bfloat16).reshape(B, S, H, D)
    v = qkv[..., 2 * E:].astype(jnp.bfloat16).reshape(B, S, H, D)

    scores = jnp.einsum('bqhd,bkhd->bhqk', q, k,
                        preferred_element_type=jnp.float32)
    causal = jnp.tril(jnp.ones((S, S), bool))[None, None]
    scores = jnp.where(causal, scores, jnp.float32(-1e30))
    attn = jax.nn.softmax(scores, axis=-1)

    ctx = jnp.einsum('bhqk,bkhd->bqhd', attn.astype(jnp.bfloat16), v,
                     preferred_element_type=jnp.float32).reshape(B, S, E)
    attn_out = jnp.einsum('bse,ef->bsf', ctx.astype(jnp.bfloat16), w_o,
                          preferred_element_type=jnp.float32) * sw
    x1 = _layernorm_fixed(x_f32 + attn_out)

    h = jnp.einsum('bse,ef->bsf', x1.astype(jnp.bfloat16), w_1,
                   preferred_element_type=jnp.float32) * sw
    h = jnp.maximum(h, 0.0)
    ff = jnp.einsum('bsf,fe->bse', h.astype(jnp.bfloat16), w2,
                    preferred_element_type=jnp.float32) * sw
    return _layernorm_fixed(x1 + ff)


if __name__ == "__main__":
    B, S, E = 4, 8, 32
    NUM_HEADS = 4
    HIDDEN = 4 * E

    key = jax.random.PRNGKey(0)
    kx, kq, kk, kv, ko, k1, k2 = jax.random.split(key, 7)

    x = jax.random.normal(kx, (B, S, E), dtype=jnp.float32)

    # binary connection masks (WANN-style shared-weight layers), PyTorch (out, in)
    def mask(k, shape):
        return jax.random.bernoulli(k, 0.7, shape).astype(jnp.float32)

    params = {
        'wq': mask(kq, (E, E)),
        'wk': mask(kk, (E, E)),
        'wv': mask(kv, (E, E)),
        'wo': mask(ko, (E, E)),
        'w1': mask(k1, (HIDDEN, E)),
        'w2': mask(k2, (E, HIDDEN)),
    }

    for sw in (1.0, 0.5):
        out = wann_transformer_block(x, params, sw, num_heads=NUM_HEADS)
        out = jax.block_until_ready(out)
        ref = reference_block(x, params, sw, NUM_HEADS)
        assert out.shape == (B, S, E)
        # Tolerance covers bf16 activation casts + approx (EUP) softmax reciprocal.
        assert jnp.allclose(out, ref, atol=2e-2, rtol=2e-2), \
            f"mismatch vs reference (shared_weight={sw})"

    print("KERNEL_OK")
</pallas_src>

<mosaic_0001>
module attributes {stable_mosaic.version = 11 : i64} {
  func.func @wann_block_kernel(%arg0: i32, %arg1: memref<2x8x32xf32, #tpu.memory_space<vmem>>, %arg2: memref<32x256xbf16, #tpu.memory_space<vmem>>, %arg3: memref<128x32xbf16, #tpu.memory_space<vmem>>, %arg4: memref<8x8xf32, #tpu.memory_space<vmem>>, %arg5: memref<2x8x32xf32, #tpu.memory_space<vmem>>) attributes {dimension_semantics = [#tpu.dimension_semantics<parallel>], iteration_bounds = array<i64: 2>, scalar_prefetch = 0 : i64, scratch_operands = 0 : i64, tpu.core_type = #tpu.core_type<tc>, window_params = [{transform_indices = @transform_0, window_bounds = array<i64: 2, 8, 32>}, {pipeline_mode = #tpu.pipeline_mode<synchronous>, transform_indices = @transform_1, window_bounds = array<i64: 32, 256>}, {pipeline_mode = #tpu.pipeline_mode<synchronous>, transform_indices = @transform_2, window_bounds = array<i64: 128, 32>}, {pipeline_mode = #tpu.pipeline_mode<synchronous>, transform_indices = @transform_3, window_bounds = array<i64: 8, 8>}, {transform_indices = @transform_4, window_bounds = array<i64: 2, 8, 32>}]} {
    %c0 = arith.constant 0 : index
    %c0_0 = arith.constant 0 : index
    %c0_1 = arith.constant 0 : index
    %0 = vector.load %arg1[%c0, %c0_0, %c0_1] : memref<2x8x32xf32, #tpu.memory_space<vmem>>, vector<2x8x32xf32>
    %1 = vector.shape_cast %0 : vector<2x8x32xf32> to vector<16x32xf32>
    %2 = arith.truncf %1 : vector<16x32xf32> to vector<16x32xbf16>
    %c0_2 = arith.constant 0 : index
    %c0_3 = arith.constant 0 : index
    %3 = vector.load %arg2[%c0_2, %c0_3] : memref<32x256xbf16, #tpu.memory_space<vmem>>, vector<32x256xbf16>
    %4 = vector.extract_strided_slice %3 {offsets = [0, 0], sizes = [32, 96], strides = [1, 1]} : vector<32x256xbf16> to vector<32x96xbf16>
    %5 = vector.extract_strided_slice %3 {offsets = [0, 96], sizes = [32, 32], strides = [1, 1]} : vector<32x256xbf16> to vector<32x32xbf16>
    %6 = vector.extract_strided_slice %3 {offsets = [0, 128], sizes = [32, 128], strides = [1, 1]} : vector<32x256xbf16> to vector<32x128xbf16>
    %cst = arith.constant dense<0.000000e+00> : vector<16x96xf32>
    %7 = tpu.matmul %2, %4, %cst {dimension_numbers = #tpu.dot_dimension_numbers<[1], [0], [0], [1], [0, 0, 1, 1], [], []>} : vector<16x32xbf16>, vector<32x96xbf16>, vector<16x96xf32> -> vector<16x96xf32>
    %8 = vector.shape_cast %7 : vector<16x96xf32> to vector<2x8x96xf32>
    %c0_4 = arith.constant 0 : index
    %c0_5 = arith.constant 0 : index
    %9 = vector.load %arg4[%c0_4, %c0_5] : memref<8x8xf32, #tpu.memory_space<vmem>>, vector<8x8xf32>
    %10 = vector.extract_strided_slice %8 {offsets = [0, 0, 0], sizes = [2, 8, 8], strides = [1, 1, 1]} : vector<2x8x96xf32> to vector<2x8x8xf32>
    %cst_6 = arith.constant 0.353553385 : f32
    %11 = vector.broadcast %cst_6 : f32 to vector<2x8x8xf32>
    %12 = arith.mulf %10, %11 : vector<2x8x8xf32>
    %13 = arith.truncf %12 : vector<2x8x8xf32> to vector<2x8x8xbf16>
    %14 = vector.extract_strided_slice %8 {offsets = [0, 0, 32], sizes = [2, 8, 8], strides = [1, 1, 1]} : vector<2x8x96xf32> to vector<2x8x8xf32>
    %15 = arith.truncf %14 : vector<2x8x8xf32> to vector<2x8x8xbf16>
    %16 = vector.extract_strided_slice %8 {offsets = [0, 0, 64], sizes = [2, 8, 8], strides = [1, 1, 1]} : vector<2x8x96xf32> to vector<2x8x8xf32>
    %17 = arith.truncf %16 : vector<2x8x8xf32> to vector<2x8x8xbf16>
    "tpu.trace_start"() <{level = 10 : i32, message = "bqd,bkd->bqk"}> : () -> ()
    %cst_7 = arith.constant dense<0.000000e+00> : vector<2x8x8xf32>
    %18 = tpu.matmul %13, %15, %cst_7 {dimension_numbers = #tpu.dot_dimension_numbers<[2], [2], [1], [1], [0, 0, 0, 1, 1, 1], [0], [0]>} : vector<2x8x8xbf16>, vector<2x8x8xbf16>, vector<2x8x8xf32> -> vector<2x8x8xf32>
    "tpu.trace_stop"() : () -> ()
    %19 = vector.shape_cast %9 : vector<8x8xf32> to vector<1x8x8xf32>
    %20 = vector.broadcast %19 : vector<1x8x8xf32> to vector<2x8x8xf32>
    %21 = arith.addf %18, %20 : vector<2x8x8xf32>
    %cst_8 = arith.constant dense<0xFF800000> : vector<2x8xf32>
    %22 = vector.multi_reduction <maximumf>, %21, %cst_8 [2] : vector<2x8x8xf32> to vector<2x8xf32>
    %23 = vector.shape_cast %22 : vector<2x8xf32> to vector<2x8x1xf32>
    %24 = vector.broadcast %23 : vector<2x8x1xf32> to vector<2x8x8xf32>
    %25 = arith.subf %21, %24 : vector<2x8x8xf32>
    %26 = math.exp %25 : vector<2x8x8xf32>
    %cst_9 = arith.constant dense<0.000000e+00> : vector<2x8xf32>
    %27 = vector.multi_reduction <add>, %26, %cst_9 [2] : vector<2x8x8xf32> to vector<2x8xf32>
    %28 = vector.shape_cast %27 : vector<2x8xf32> to vector<2x8x1xf32>
    %29 = tpu.reciprocal %28 {approx = true} : vector<2x8x1xf32> -> vector<2x8x1xf32>
    %30 = vector.broadcast %29 : vector<2x8x1xf32> to vector<2x8x8xf32>
    %31 = arith.mulf %26, %30 : vector<2x8x8xf32>
    %32 = arith.truncf %31 : vector<2x8x8xf32> to vector<2x8x8xbf16>
    "tpu.trace_start"() <{level = 10 : i32, message = "bqk,bkd->bqd"}> : () -> ()
    %cst_10 = arith.constant dense<0.000000e+00> : vector<2x8x8xf32>
    %33 = tpu.matmul %32, %17, %cst_10 {dimension_numbers = #tpu.dot_dimension_numbers<[2], [1], [1], [2], [0, 0, 0, 1, 1, 2], [0], [0]>} : vector<2x8x8xbf16>, vector<2x8x8xbf16>, vector<2x8x8xf32> -> vector<2x8x8xf32>
    "tpu.trace_stop"() : () -> ()
    %34 = vector.extract_strided_slice %8 {offsets = [0, 0, 8], sizes = [2, 8, 8], strides = [1, 1, 1]} : vector<2x8x96xf32> to vector<2x8x8xf32>
    %cst_11 = arith.constant 0.353553385 : f32
    %35 = vector.broadcast %cst_11 : f32 to vector<2x8x8xf32>
    %36 = arith.mulf %34, %35 : vector<2x8x8xf32>
    %37 = arith.truncf %36 : vector<2x8x8xf32> to vector<2x8x8xbf16>
    %38 = vector.extract_strided_slice %8 {offsets = [0, 0, 40], sizes = [2, 8, 8], strides = [1, 1, 1]} : vector<2x8x96xf32> to vector<2x8x8xf32>
    %39 = arith.truncf %38 : vector<2x8x8xf32> to vector<2x8x8xbf16>
    %40 = vector.extract_strided_slice %8 {offsets = [0, 0, 72], sizes = [2, 8, 8], strides = [1, 1, 1]} : vector<2x8x96xf32> to vector<2x8x8xf32>
    %41 = arith.truncf %40 : vector<2x8x8xf32> to vector<2x8x8xbf16>
    "tpu.trace_start"() <{level = 10 : i32, message = "bqd,bkd->bqk"}> : () -> ()
    %cst_12 = arith.constant dense<0.000000e+00> : vector<2x8x8xf32>
    %42 = tpu.matmul %37, %39, %cst_12 {dimension_numbers = #tpu.dot_dimension_numbers<[2], [2], [1], [1], [0, 0, 0, 1, 1, 1], [0], [0]>} : vector<2x8x8xbf16>, vector<2x8x8xbf16>, vector<2x8x8xf32> -> vector<2x8x8xf32>
    "tpu.trace_stop"() : () -> ()
    %43 = vector.shape_cast %9 : vector<8x8xf32> to vector<1x8x8xf32>
    %44 = vector.broadcast %43 : vector<1x8x8xf32> to vector<2x8x8xf32>
    %45 = arith.addf %42, %44 : vector<2x8x8xf32>
    %cst_13 = arith.constant dense<0xFF800000> : vector<2x8xf32>
    %46 = vector.multi_reduction <maximumf>, %45, %cst_13 [2] : vector<2x8x8xf32> to vector<2x8xf32>
    %47 = vector.shape_cast %46 : vector<2x8xf32> to vector<2x8x1xf32>
    %48 = vector.broadcast %47 : vector<2x8x1xf32> to vector<2x8x8xf32>
    %49 = arith.subf %45, %48 : vector<2x8x8xf32>
    %50 = math.exp %49 : vector<2x8x8xf32>
    %cst_14 = arith.constant dense<0.000000e+00> : vector<2x8xf32>
    %51 = vector.multi_reduction <add>, %50, %cst_14 [2] : vector<2x8x8xf32> to vector<2x8xf32>
    %52 = vector.shape_cast %51 : vector<2x8xf32> to vector<2x8x1xf32>
    %53 = tpu.reciprocal %52 {approx = true} : vector<2x8x1xf32> -> vector<2x8x1xf32>
    %54 = vector.broadcast %53 : vector<2x8x1xf32> to vector<2x8x8xf32>
    %55 = arith.mulf %50, %54 : vector<2x8x8xf32>
    %56 = arith.truncf %55 : vector<2x8x8xf32> to vector<2x8x8xbf16>
    "tpu.trace_start"() <{level = 10 : i32, message = "bqk,bkd->bqd"}> : () -> ()
    %cst_15 = arith.constant dense<0.000000e+00> : vector<2x8x8xf32>
    %57 = tpu.matmul %56, %41, %cst_15 {dimension_numbers = #tpu.dot_dimension_numbers<[2], [1], [1], [2], [0, 0, 0, 1, 1, 2], [0], [0]>} : vector<2x8x8xbf16>, vector<2x8x8xbf16>, vector<2x8x8xf32> -> vector<2x8x8xf32>
    "tpu.trace_stop"() : () -> ()
    %58 = vector.extract_strided_slice %8 {offsets = [0, 0, 16], sizes = [2, 8, 8], strides = [1, 1, 1]} : vector<2x8x96xf32> to vector<2x8x8xf32>
    %cst_16 = arith.constant 0.353553385 : f32
    %59 = vector.broadcast %cst_16 : f32 to vector<2x8x8xf32>
    %60 = arith.mulf %58, %59 : vector<2x8x8xf32>
    %61 = arith.truncf %60 : vector<2x8x8xf32> to vector<2x8x8xbf16>
    %62 = vector.extract_strided_slice %8 {offsets = [0, 0, 48], sizes = [2, 8, 8], strides = [1, 1, 1]} : vector<2x8x96xf32> to vector<2x8x8xf32>
    %63 = arith.truncf %62 : vector<2x8x8xf32> to vector<2x8x8xbf16>
    %64 = vector.extract_strided_slice %8 {offsets = [0, 0, 80], sizes = [2, 8, 8], strides = [1, 1, 1]} : vector<2x8x96xf32> to vector<2x8x8xf32>
    %65 = arith.truncf %64 : vector<2x8x8xf32> to vector<2x8x8xbf16>
    "tpu.trace_start"() <{level = 10 : i32, message = "bqd,bkd->bqk"}> : () -> ()
    %cst_17 = arith.constant dense<0.000000e+00> : vector<2x8x8xf32>
    %66 = tpu.matmul %61, %63, %cst_17 {dimension_numbers = #tpu.dot_dimension_numbers<[2], [2], [1], [1], [0, 0, 0, 1, 1, 1], [0], [0]>} : vector<2x8x8xbf16>, vector<2x8x8xbf16>, vector<2x8x8xf32> -> vector<2x8x8xf32>
    "tpu.trace_stop"() : () -> ()
    %67 = vector.shape_cast %9 : vector<8x8xf32> to vector<1x8x8xf32>
    %68 = vector.broadcast %67 : vector<1x8x8xf32> to vector<2x8x8xf32>
    %69 = arith.addf %66, %68 : vector<2x8x8xf32>
    %cst_18 = arith.constant dense<0xFF800000> : vector<2x8xf32>
    %70 = vector.multi_reduction <maximumf>, %69, %cst_18 [2] : vector<2x8x8xf32> to vector<2x8xf32>
    %71 = vector.shape_cast %70 : vector<2x8xf32> to vector<2x8x1xf32>
    %72 = vector.broadcast %71 : vector<2x8x1xf32> to vector<2x8x8xf32>
    %73 = arith.subf %69, %72 : vector<2x8x8xf32>
    %74 = math.exp %73 : vector<2x8x8xf32>
    %cst_19 = arith.constant dense<0.000000e+00> : vector<2x8xf32>
    %75 = vector.multi_reduction <add>, %74, %cst_19 [2] : vector<2x8x8xf32> to vector<2x8xf32>
    %76 = vector.shape_cast %75 : vector<2x8xf32> to vector<2x8x1xf32>
    %77 = tpu.reciprocal %76 {approx = true} : vector<2x8x1xf32> -> vector<2x8x1xf32>
    %78 = vector.broadcast %77 : vector<2x8x1xf32> to vector<2x8x8xf32>
    %79 = arith.mulf %74, %78 : vector<2x8x8xf32>
    %80 = arith.truncf %79 : vector<2x8x8xf32> to vector<2x8x8xbf16>
    "tpu.trace_start"() <{level = 10 : i32, message = "bqk,bkd->bqd"}> : () -> ()
    %cst_20 = arith.constant dense<0.000000e+00> : vector<2x8x8xf32>
    %81 = tpu.matmul %80, %65, %cst_20 {dimension_numbers = #tpu.dot_dimension_numbers<[2], [1], [1], [2], [0, 0, 0, 1, 1, 2], [0], [0]>} : vector<2x8x8xbf16>, vector<2x8x8xbf16>, vector<2x8x8xf32> -> vector<2x8x8xf32>
    "tpu.trace_stop"() : () -> ()
    %82 = vector.extract_strided_slice %8 {offsets = [0, 0, 24], sizes = [2, 8, 8], strides = [1, 1, 1]} : vector<2x8x96xf32> to vector<2x8x8xf32>
    %cst_21 = arith.constant 0.353553385 : f32
    %83 = vector.broadcast %cst_21 : f32 to vector<2x8x8xf32>
    %84 = arith.mulf %82, %83 : vector<2x8x8xf32>
    %85 = arith.truncf %84 : vector<2x8x8xf32> to vector<2x8x8xbf16>
    %86 = vector.extract_strided_slice %8 {offsets = [0, 0, 56], sizes = [2, 8, 8], strides = [1, 1, 1]} : vector<2x8x96xf32> to vector<2x8x8xf32>
    %87 = arith.truncf %86 : vector<2x8x8xf32> to vector<2x8x8xbf16>
    %88 = vector.extract_strided_slice %8 {offsets = [0, 0, 88], sizes = [2, 8, 8], strides = [1, 1, 1]} : vector<2x8x96xf32> to vector<2x8x8xf32>
    %89 = arith.truncf %88 : vector<2x8x8xf32> to vector<2x8x8xbf16>
    "tpu.trace_start"() <{level = 10 : i32, message = "bqd,bkd->bqk"}> : () -> ()
    %cst_22 = arith.constant dense<0.000000e+00> : vector<2x8x8xf32>
    %90 = tpu.matmul %85, %87, %cst_22 {dimension_numbers = #tpu.dot_dimension_numbers<[2], [2], [1], [1], [0, 0, 0, 1, 1, 1], [0], [0]>} : vector<2x8x8xbf16>, vector<2x8x8xbf16>, vector<2x8x8xf32> -> vector<2x8x8xf32>
    "tpu.trace_stop"() : () -> ()
    %91 = vector.shape_cast %9 : vector<8x8xf32> to vector<1x8x8xf32>
    %92 = vector.broadcast %91 : vector<1x8x8xf32> to vector<2x8x8xf32>
    %93 = arith.addf %90, %92 : vector<2x8x8xf32>
    %cst_23 = arith.constant dense<0xFF800000> : vector<2x8xf32>
    %94 = vector.multi_reduction <maximumf>, %93, %cst_23 [2] : vector<2x8x8xf32> to vector<2x8xf32>
    %95 = vector.shape_cast %94 : vector<2x8xf32> to vector<2x8x1xf32>
    %96 = vector.broadcast %95 : vector<2x8x1xf32> to vector<2x8x8xf32>
    %97 = arith.subf %93, %96 : vector<2x8x8xf32>
    %98 = math.exp %97 : vector<2x8x8xf32>
    %cst_24 = arith.constant dense<0.000000e+00> : vector<2x8xf32>
    %99 = vector.multi_reduction <add>, %98, %cst_24 [2] : vector<2x8x8xf32> to vector<2x8xf32>
    %100 = vector.shape_cast %99 : vector<2x8xf32> to vector<2x8x1xf32>
    %101 = tpu.reciprocal %100 {approx = true} : vector<2x8x1xf32> -> vector<2x8x1xf32>
    %102 = vector.broadcast %101 : vector<2x8x1xf32> to vector<2x8x8xf32>
    %103 = arith.mulf %98, %102 : vector<2x8x8xf32>
    %104 = arith.truncf %103 : vector<2x8x8xf32> to vector<2x8x8xbf16>
    "tpu.trace_start"() <{level = 10 : i32, message = "bqk,bkd->bqd"}> : () -> ()
    %cst_25 = arith.constant dense<0.000000e+00> : vector<2x8x8xf32>
    %105 = tpu.matmul %104, %89, %cst_25 {dimension_numbers = #tpu.dot_dimension_numbers<[2], [1], [1], [2], [0, 0, 0, 1, 1, 2], [0], [0]>} : vector<2x8x8xbf16>, vector<2x8x8xbf16>, vector<2x8x8xf32> -> vector<2x8x8xf32>
    "tpu.trace_stop"() : () -> ()
    %106 = tpu.concatenate %33, %57, %81, %105 in 2 : vector<2x8x8xf32>, vector<2x8x8xf32>, vector<2x8x8xf32>, vector<2x8x8xf32> -> vector<2x8x32xf32>
    %107 = vector.shape_cast %106 : vector<2x8x32xf32> to vector<16x32xf32>
    %108 = arith.truncf %107 : vector<16x32xf32> to vector<16x32xbf16>
    %cst_26 = arith.constant dense<0.000000e+00> : vector<16x32xf32>
    %109 = tpu.matmul %108, %5, %cst_26 {dimension_numbers = #tpu.dot_dimension_numbers<[1], [0], [0], [1], [0, 0, 1, 1], [], []>} : vector<16x32xbf16>, vector<32x32xbf16>, vector<16x32xf32> -> vector<16x32xf32>
    %110 = arith.addf %1, %109 : vector<16x32xf32>
    %cst_27 = arith.constant dense<0.000000e+00> : vector<16xf32>
    %111 = vector.multi_reduction <add>, %110, %cst_27 [1] : vector<16x32xf32> to vector<16xf32>
    %112 = vector.shape_cast %111 : vector<16xf32> to vector<16x1xf32>
    %113 = arith.mulf %110, %110 : vector<16x32xf32>
    %cst_28 = arith.constant dense<0.000000e+00> : vector<16xf32>
    %114 = vector.multi_reduction <add>, %113, %cst_28 [1] : vector<16x32xf32> to vector<16xf32>
    %115 = vector.shape_cast %114 : vector<16xf32> to vector<16x1xf32>
    %cst_29 = arith.constant 3.125000e-02 : f32
    %116 = vector.broadcast %cst_29 : f32 to vector<16x1xf32>
    %117 = arith.mulf %112, %116 : vector<16x1xf32>
    %cst_30 = arith.constant 3.125000e-02 : f32
    %118 = vector.broadcast %cst_30 : f32 to vector<16x1xf32>
    %119 = arith.mulf %115, %118 : vector<16x1xf32>
    %120 = arith.mulf %117, %117 : vector<16x1xf32>
    %121 = arith.subf %119, %120 : vector<16x1xf32>
    %cst_31 = arith.constant 0.000000e+00 : f32
    %122 = vector.broadcast %cst_31 : f32 to vector<16x1xf32>
    %123 = arith.maximumf %121, %122 : vector<16x1xf32>
    %124 = vector.broadcast %117 : vector<16x1xf32> to vector<16x32xf32>
    %125 = arith.subf %110, %124 : vector<16x32xf32>
    %cst_32 = arith.constant 9.99999974E-6 : f32
    %126 = vector.broadcast %cst_32 : f32 to vector<16x1xf32>
    %127 = arith.addf %123, %126 : vector<16x1xf32>
    %128 = math.rsqrt %127 : vector<16x1xf32>
    %129 = vector.broadcast %128 : vector<16x1xf32> to vector<16x32xf32>
    %130 = arith.mulf %125, %129 : vector<16x32xf32>
    %131 = arith.truncf %130 : vector<16x32xf32> to vector<16x32xbf16>
    %cst_33 = arith.constant dense<0.000000e+00> : vector<16x128xf32>
    %132 = tpu.matmul %131, %6, %cst_33 {dimension_numbers = #tpu.dot_dimension_numbers<[1], [0], [0], [1], [0, 0, 1, 1], [], []>} : vector<16x32xbf16>, vector<32x128xbf16>, vector<16x128xf32> -> vector<16x128xf32>
    %cst_34 = arith.constant 0.000000e+00 : f32
    %133 = vector.broadcast %cst_34 : f32 to vector<16x128xf32>
    %134 = arith.maximumf %132, %133 : vector<16x128xf32>
    %135 = arith.truncf %134 : vector<16x128xf32> to vector<16x128xbf16>
    %c0_35 = arith.constant 0 : index
    %c0_36 = arith.constant 0 : index
    %136 = vector.load %arg3[%c0_35, %c0_36] : memref<128x32xbf16, #tpu.memory_space<vmem>>, vector<128x32xbf16>
    %cst_37 = arith.constant dense<0.000000e+00> : vector<16x32xf32>
    %137 = tpu.matmul %135, %136, %cst_37 {dimension_numbers = #tpu.dot_dimension_numbers<[1], [0], [0], [1], [0, 0, 1, 1], [], []>} : vector<16x128xbf16>, vector<128x32xbf16>, vector<16x32xf32> -> vector<16x32xf32>
    %138 = arith.addf %130, %137 : vector<16x32xf32>
    %cst_38 = arith.constant dense<0.000000e+00> : vector<16xf32>
    %139 = vector.multi_reduction <add>, %138, %cst_38 [1] : vector<16x32xf32> to vector<16xf32>
    %140 = vector.shape_cast %139 : vector<16xf32> to vector<16x1xf32>
    %141 = arith.mulf %138, %138 : vector<16x32xf32>
    %cst_39 = arith.constant dense<0.000000e+00> : vector<16xf32>
    %142 = vector.multi_reduction <add>, %141, %cst_39 [1] : vector<16x32xf32> to vector<16xf32>
    %143 = vector.shape_cast %142 : vector<16xf32> to vector<16x1xf32>
    %cst_40 = arith.constant 3.125000e-02 : f32
    %144 = vector.broadcast %cst_40 : f32 to vector<16x1xf32>
    %145 = arith.mulf %140, %144 : vector<16x1xf32>
    %cst_41 = arith.constant 3.125000e-02 : f32
    %146 = vector.broadcast %cst_41 : f32 to vector<16x1xf32>
    %147 = arith.mulf %143, %146 : vector<16x1xf32>
    %148 = arith.mulf %145, %145 : vector<16x1xf32>
    %149 = arith.subf %147, %148 : vector<16x1xf32>
    %cst_42 = arith.constant 0.000000e+00 : f32
    %150 = vector.broadcast %cst_42 : f32 to vector<16x1xf32>
    %151 = arith.maximumf %149, %150 : vector<16x1xf32>
    %152 = vector.broadcast %145 : vector<16x1xf32> to vector<16x32xf32>
    %153 = arith.subf %138, %152 : vector<16x32xf32>
    %cst_43 = arith.constant 9.99999974E-6 : f32
    %154 = vector.broadcast %cst_43 : f32 to vector<16x1xf32>
    %155 = arith.addf %151, %154 : vector<16x1xf32>
    %156 = math.rsqrt %155 : vector<16x1xf32>
    %157 = vector.broadcast %156 : vector<16x1xf32> to vector<16x32xf32>
    %158 = arith.mulf %153, %157 : vector<16x32xf32>
    %159 = vector.shape_cast %158 : vector<16x32xf32> to vector<2x8x32xf32>
    %c0_44 = arith.constant 0 : index
    %c0_45 = arith.constant 0 : index
    %c0_46 = arith.constant 0 : index
    %160 = vector.load %arg5[%c0_44, %c0_45, %c0_46] : memref<2x8x32xf32, #tpu.memory_space<vmem>>, vector<2x8x32xf32>
    tpu.vector_store %arg5[%c0_44, %c0_45, %c0_46], %159 {strides = array<i32>} : memref<2x8x32xf32, #tpu.memory_space<vmem>>, vector<2x8x32xf32>,
    return
  }
  func.func @transform_0(%arg0: i32) -> (i32, i32, i32) {
    %c0_i32 = arith.constant 0 : i32
    %c0_i32_0 = arith.constant 0 : i32
    %c0_i32_1 = arith.constant 0 : i32
    return %arg0, %c0_i32, %c0_i32_0 : i32, i32, i32
  }
  func.func @transform_1(%arg0: i32) -> (i32, i32) {
    %c0_i32 = arith.constant 0 : i32
    %c0_i32_0 = arith.constant 0 : i32
    %c0_i32_1 = arith.constant 0 : i32
    return %c0_i32, %c0_i32_0 : i32, i32
  }
  func.func @transform_2(%arg0: i32) -> (i32, i32) {
    %c0_i32 = arith.constant 0 : i32
    %c0_i32_0 = arith.constant 0 : i32
    %c0_i32_1 = arith.constant 0 : i32
    return %c0_i32, %c0_i32_0 : i32, i32
  }
  func.func @transform_3(%arg0: i32) -> (i32, i32) {
    %c0_i32 = arith.constant 0 : i32
    %c0_i32_0 = arith.constant 0 : i32
    %c0_i32_1 = arith.constant 0 : i32
    return %c0_i32, %c0_i32_0 : i32, i32
  }
  func.func @transform_4(%arg0: i32) -> (i32, i32, i32) {
    %c0_i32 = arith.constant 0 : i32
    %c0_i32_0 = arith.constant 0 : i32
    %c0_i32_1 = arith.constant 0 : i32
    return %arg0, %c0_i32, %c0_i32_0 : i32, i32, i32
  }
}

</mosaic_0001>

<bundles_post_ra>
// kernel: tpu_custom_call.1
= control target key start
LH: loop header
LB: loop body
LE: loop exit
PB: predicated region body
PF: predicated region fallthrough
CT: control target
= control target key end

     0   :  { %9 = vsyncpa [#allocation3], 0  ;;  %s2360_s0 = inlined_call_operand.vmem [shape: f32[4,8,32], index: 0, kind: input, shape index: {}]   ;;  %s2361_s1 = inlined_call_operand.vmem [shape: bf16[32,256], index: 1, kind: input, shape index: {}]   ;;  %s2362_s2 = inlined_call_operand.vmem [shape: bf16[128,32], index: 2, kind: input, shape index: {}]   ;;  %s2363_s3 = inlined_call_operand.vmem [shape: f32[8,8], index: 3, kind: input, shape index: {}]   ;;  %s2364_s4 = inlined_call_operand.hbm [shape: f32[4,8,32], index: 4, kind: output, shape index: {}]  }
   0x1   :  { %11 = vsyncpa [#allocation3 + $0x1], 0  ;;  %s2011_s15 = smov 0   ;;  %s2013_s16 = smov 0  }
   0x2   :  { %s2015_s17 = smov 0   ;;  %s2017_s18 = smov 0  }
   0x3 LB: > { %s2032_s19 = sadd.s32 4294967295, %s1965_s18   ;;  %s1543_s20 = sadd.s32 4294967294, %s1965_s18   ;;  %s1965_s18 = sphi %s2017_s18, %s2370_s18   ;;  %s1961_s17 = sphi %s2015_s17, %s2369_s17   ;;  %s1957_s16 = sphi %s2013_s16, %s2368_s16   ;;  %s1953_s15 = sphi %s2011_s15, %s2367_s15  }
   0x4   : > { %s2036_s21 = sadd.s32 1, %s1965_s18   ;;  %s113_s22 = sadd.s32 1, %s1961_s17 }
   0x5   : > { %s110_s23 = ssub.s32 %s1965_s18, %s2036_s21  ;;  %p123_p0 = scmp.ne.s32.totalorder %s1961_s17, %s1957_s16 }
   0x6   : > { %p111_p1 = scmp.eq.s32.totalorder %s110_s23, 0  ;;  %p124_p2 = scmp.eq.s32.totalorder %s2032_s19, 1 }
   0x7   : > { %p129_p3 = scmp.ne.s32.totalorder %s1957_s16, %s1953_s15  ;;  %p130_p4 = scmp.eq.s32.totalorder %s1543_s20, 1 }
   0x8   : > { %s2047_s24 = scalar_select %p111_p1, %s1961_s17, %s113_s22  }
   0x9   : > { %p2049_p5 = por %p124_p2, %p123_p0  ;;  %p2053_p6 = por %p130_p4, %p129_p3 }
   0xa   : > { %p1546_p7 = scmp.ge.s32.totalorder %s1965_s18, 1  ;;  %p166_p8 = scmp.lt.s32.totalorder %s1965_s18, 3 }
   0xc   : > { %p167_p9 = pnand %p1546_p7, %p166_p8 }
   0xd   : > { %v2062_v0 = vld [vmem:[%s2361_s1] ss:$8 sps:$4 sm:$0xff] (!%p167_p9)   ;;  %v1967_v1 = vmov (!%p167_p9), 0.0   ;;  %vm1968_vm0 = vmmov (!%p167_p9), 0   ;;  %s1548_s29 = sshll.u32 (!%p167_p9), %s2032_s19, 1  ;;  %vm219_vm1 = vcmask (!%p167_p9), 261120  }
   0xe   : > { %170 = sbr.rel (%p167_p9) target bundleno = 3853 (0xf0d), region = 36  ;;  %1637 = vmatprep.subr.bf16.mxu0 (!%p167_p9), %v1967_v1  ;;  %1641 = vmatprep.mubr.msk.bf16.mxu0 (!%p167_p9), %vm1968_vm0, %v1967_v1  ;;  %v2072_v2 = vld [vmem:[%s2361_s1 + $0x10] ss:$8 sps:$4 sm:$0xff] (!%p167_p9)   ;;  %p193_p10 = scmp.lt.s32.totalorder (!%p167_p9), %s1548_s29, 3  ;;  %vm274_vm2 = vcmask (!%p167_p9), 64512   ;;  %v2117_v20 = vld [vmem:[%s2363_s3] sm:$0xff] (!%p167_p9) }
   0xf   : > { %1638 = vmatpush3.bf16.msra.mxu0 (!%p167_p9), %v2062_v0  ;;  %1657 = vmatprep.subr.bf16.mxu1 (!%p167_p9), %v1967_v1  ;;  %s1969_s10 = smov (!%p167_p9), 96   ;;  %s1970_s13 = smov (!%p167_p9), 64   ;;  %vm399_vm3 = vcmask (!%p167_p9), 1043456   ;;  %vm1179_vm4 = vcmask (!%p167_p9), 130048   ;;  %vm1182_vm5 = vcmask (!%p167_p9), 195584  }
  0x10   : > { %1639 = vmatprep.subr.bf16.mxu0 (!%p167_p9), %v1967_v1  ;;  %1659 = vmatprep.mubr.msk.bf16.mxu1 (!%p167_p9), %vm1968_vm0, %v1967_v1  ;;  %s1971_s14 = smov (!%p167_p9), 88   ;;  %s1972_s20 = smov (!%p167_p9), 120  }
  0x11   : > { %s1973_s22 = smov (!%p167_p9), 56   ;;  %s1974_s23 = smov (!%p167_p9), 80  }
  0x12   : > { %s1975_s27 = smov (!%p167_p9), 112   ;;  %s1976_s28 = smov (!%p167_p9), 48  }
  0x13   : > { %1640 = vmatpush3.bf16.msra.mxu0 (!%p167_p9), %v2072_v2  ;;  %s1978_s30 = smov (!%p167_p9), 104   ;;  %s1979_s5 = smov (!%p167_p9), 40  }
  0x14   : > { %1645 = vmatprep.subr.bf16.mxu0 (!%p167_p9), %v1967_v1  ;;  %s1981_s7 = smov (!%p167_p9), 8   ;;  %s1982_s8 = smov (!%p167_p9), 16  }
  0x15   : > { %s2372_s29 = smov (!%p193_p10, %s1548_s29), 3 }
  0x16   : > { %s1549_s6 = sshll.u32 %s2372_s29, 3  ;;  %s1977_s29 = smov 72  }
  0x17   : > { %s196_s9 = scalar_lea.vmem %s2360_s0, %s1549_s6  ;;  %s1980_s6 = smov 32  }
  0x18   : > { %v2083_v3 = vld [vmem:[%s196_s9] sm:$0xff]  ;;  %v2085_v4 = vld [vmem:[%s196_s9 + $0x8] sm:$0xff] }
  0x19   : > { %v202_v5 = vpack.c.bf16 %v2085_v4, %v2083_v3 }
  0x1b   : > { %1642 = vmatmul.mubr.msk.bf16.vlgmr.msra.gmra.mrb[0].mxu0 %vm219_vm1, %v202_v5 }
  0x1c   : > { %1647 = vmatprep.mubr.msk.bf16.mxu0 %vm1968_vm0, %v1967_v1 }
  0xee   : > { %v257_v6 = vpop.f32.mrb[0].mxu0 }
  0xef   : > { %v2092_v7 = vpack.c.bf16 %v257_v6, %v257_v6  ;;  %v1643_v8 = vpop.f32.mrb[1].mxu0  ;;  %v265_v14 = vmul.f32 0.35355338, %v257_v6 }
  0xf0   : > { %v260_v9 = vpop.f32.mrb[2].mxu0 }
  0xf1   : > { %272 = vrot.lane.b32.xlu0 %v2092_v7, %s1969_s10  ;;  %v1644_v10 = vpop.f32.mrb[3].mxu0  ;;  %v2095_v11 = vpack.c.bf16 %v260_v9, %v260_v9  ;;  %v2100_v16 = vpack.c.bf16 %v265_v14, %v265_v14  ;;  %v266_v18 = vmul.f32 0.35355338, %v260_v9 }
  0xf3   : > { %v2108_v19 = vpack.c.bf16 %v266_v18, %v266_v18 }
  0xf5   : > { %322 = vrot.lane.b32.xlu0 %v2095_v11, %s1969_s10 }
 0x163   : > { %v273_v12 = vpop.permute.xlu0 %272 }
 0x164   : > { %v279_v13 = vsel %vm274_vm2, %v273_v12, 0 }
 0x165   : > { %1646 = vmatpush3.bf16.xpose.msra.mxu0 %v279_v13 }
 0x166   : > { %1651 = vmatprep.subr.bf16.mxu0 %v1967_v1 }
 0x167   : > { %v323_v15 = vpop.permute.xlu0 %322 }
 0x168   : > { %v328_v17 = vsel %vm274_vm2, %v323_v15, 0 }
 0x16c   : > { %1648 = vmatmul.mubr.msk.bf16.vlgmr.msra.gmra.mrb[4].mxu0 %vm274_vm2, %v2100_v16 }
 0x16d   : > { %1652 = vmatpush3.bf16.xpose.msra.mxu0 %v328_v17  ;;  %1653 = vmatprep.mubr.msk.bf16.mxu0 %vm1968_vm0, %v1967_v1 }
 0x16e   : > { %1663 = vmatprep.subr.bf16.mxu0 %v1967_v1 }
 0x174   : > { %1654 = vmatmul.mubr.msk.bf16.vlgmr.msra.gmra.mrb[8].mxu0 %vm274_vm2, %v2108_v19 }
 0x175   : > { %1665 = vmatprep.mubr.msk.bf16.mxu0 %vm1968_vm0, %v1967_v1 }
 0x23f   : > { %v315_v21 = vpop.f32.mrb[4].mxu0 }
 0x240   : > { %v316_v22 = vadd.f32 %v315_v21, %v2117_v20  ;;  %v1649_v23 = vpop.f32.mrb[5].mxu0 }
 0x241   : > { %v318_v24 = vpop.f32.mrb[6].mxu0 }
 0x242   : > { %v1650_v25 = vpop.f32.mrb[7].mxu0  ;;  %v370_v26 = vsel %vm274_vm2, %v316_v22, -inf }
 0x243   : > { %371 = vmax.xlane.f32.xlu1 %v370_v26 }
 0x247   : > { %v364_v27 = vpop.f32.mrb[8].mxu0 }
 0x248   : > { %v365_v28 = vadd.f32 %v364_v27, %v2117_v20  ;;  %v1655_v29 = vpop.f32.mrb[9].mxu0 }
 0x249   : > { %v367_v30 = vpop.f32.mrb[10].mxu0 }
 0x24a   : > { %v1656_v31 = vpop.f32.mrb[11].mxu0  ;;  %v373_v32 = vsel %vm274_vm2, %v365_v28, -inf }
 0x24b   : > { %374 = vmax.xlane.f32.xlu1 %v373_v32 }
 0x25c   : > { %394 = vrot.lane.b32.xlu1 %v2092_v7, %s1970_s13 }
 0x260   : > { %443 = vrot.lane.b32.xlu1 %v2095_v11, %s1970_s13  ;;  %s1983_s13 = smov 24  }
 0x264   : > { %494 = vrot.lane.b32.xlu1 %v2092_v7, %s1971_s14 }
 0x2d0   : > { %v372_v33 = vpop.xlane.xlu1 %371 }
 0x2d1   : > { %v376_v34 = vsub.f32 %v316_v22, %v372_v33 }
 0x2d3   : > { %v378_v35 = vmul.f32 1.442695, %v376_v34 }
 0x2d5   : > { %1863 = vpow2.f32 %v378_v35 }
 0x2d8   : > { %v375_v36 = vpop.xlane.xlu1 %374 }
 0x2d9   : > { %v377_v37 = vsub.f32 %v365_v28, %v375_v36 }
 0x2db   : > { %v380_v38 = vmul.f32 1.442695, %v377_v37 }
 0x2dc   : > { %v395_v39 = vpop.permute.xlu1 %394 }
 0x2dd   : > { %1865 = vpow2.f32 %v380_v38  ;;  %v401_v40 = vsel %vm399_vm3, %v395_v39, 0 }
 0x2de   : > { %1658 = vmatpush3.bf16.msra.mxu1 %v401_v40 }
 0x2df   : > { %v1864_v41 = vpop.eup %1863  ;;  %1669 = vmatprep.subr.bf16.mxu1 %v1967_v1 }
 0x2e0   : > { %v444_v42 = vpop.permute.xlu1 %443  ;;  %v382_v43 = vsel %vm274_vm2, %v1864_v41, 0.0 }
 0x2e1   : > { %v449_v44 = vsel %vm399_vm3, %v444_v42, 0  ;;  %383 = vadd.xlane.f32.xlu0 %v382_v43 }
 0x2e2   : > { %1664 = vmatpush3.bf16.msra.mxu0 %v449_v44 }
 0x2e3   : > { %1675 = vmatprep.subr.bf16.mxu0 %v1967_v1 }
 0x2e4   : > { %v495_v48 = vpop.permute.xlu1 %494 }
 0x2e5   : > { %v500_v53 = vsel %vm274_vm2, %v495_v48, 0 }
 0x2e7   : > { %v1866_v45 = vpop.eup %1865 }
 0x2e8   : > { %v385_v46 = vsel %vm274_vm2, %v1866_v45, 0.0 }
 0x2e9   : > { %386 = vadd.xlane.f32.xlu1 %v385_v46 }
 0x2f7   : > { %492 = vrot.lane.b32.xlu0 %v2100_v16, %s1972_s20 }
 0x2fa   : > { %545 = vrot.lane.b32.xlu1 %v2095_v11, %s1971_s14  ;;  %s189_s14 = sand.u32 1, %s1957_s16  }
 0x2fe   : > { %543 = vrot.lane.b32.xlu1 %v2108_v19, %s1972_s20  ;;  %s1547_s20 = sshll.u32 %s189_s14, 4 }
 0x36e   : > { %v384_v47 = vpop.xlane.xlu0 %383 }
 0x36f   : > { %1867 = vrcp.f32 %v384_v47 }
 0x372   : > { %v493_v58 = vpop.permute.xlu0 %492 }
 0x376   : > { %v387_v49 = vpop.xlane.xlu1 %386 }
 0x377   : > { %1869 = vrcp.f32 %v387_v49 }
 0x379   : > { %v1868_v50 = vpop.eup %1867 }
 0x37a   : > { %v390_v51 = vmul.f32 %v1868_v50, %v1864_v41  ;;  %v546_v56 = vpop.permute.xlu1 %545 }
 0x37b   : > { %v551_v59 = vsel %vm274_vm2, %v546_v56, 0 }
 0x37c   : > { %v392_v52 = vpack.c.bf16 %v390_v51, %v390_v51 }
 0x37e   : > { %1660 = vmatmul.mubr.msk.bf16.vlgmr.msra.gmra.mrb[0].mxu1 %vm274_vm2, %v392_v52  ;;  %v544_v60 = vpop.permute.xlu1 %543 }
 0x37f   : > { %1670 = vmatpush3.bf16.xpose.msra.mxu1 %v500_v53  ;;  %1671 = vmatprep.mubr.msk.bf16.mxu1 %vm1968_vm0, %v1967_v1 }
 0x380   : > { %1681 = vmatprep.subr.bf16.mxu1 %v1967_v1 }
 0x381   : > { %v1870_v54 = vpop.eup %1869 }
 0x382   : > { %v391_v55 = vmul.f32 %v1870_v54, %v1866_v45 }
 0x384   : > { %v393_v57 = vpack.c.bf16 %v391_v55, %v391_v55 }
 0x386   : > { %1666 = vmatmul.mubr.msk.bf16.vlgmr.msra.gmra.mrb[12].mxu0 %vm274_vm2, %v393_v57  ;;  %1672 = vmatmul.mubr.msk.bf16.vlgmr.msra.gmra.mrb[4].mxu1 %vm274_vm2, %v493_v58 }
 0x387   : > { %1676 = vmatpush3.bf16.xpose.msra.mxu0 %v551_v59  ;;  %1677 = vmatprep.mubr.msk.bf16.mxu0 %vm1968_vm0, %v1967_v1 }
 0x388   : > { %1687 = vmatprep.subr.bf16.mxu0 %v1967_v1  ;;  %1683 = vmatprep.mubr.msk.bf16.mxu1 %vm1968_vm0, %v1967_v1 }
 0x38e   : > { %1678 = vmatmul.mubr.msk.bf16.vlgmr.msra.gmra.mrb[16].mxu0 %vm274_vm2, %v544_v60 }
 0x38f   : > { %1689 = vmatprep.mubr.msk.bf16.mxu0 %vm1968_vm0, %v1967_v1 }
 0x451   : > { %v2151_v61 = vpop.f32.mrb[0].mxu1 }
 0x452   : > { %v1661_v62 = vpop.f32.mrb[1].mxu1 }
 0x453   : > { %v440_v63 = vpop.f32.mrb[2].mxu1 }
 0x454   : > { %v1662_v5 = vpop.f32.mrb[3].mxu1 }
 0x459   : > { %v2153_v6 = vpop.f32.mrb[12].mxu0  ;;  %v536_v8 = vpop.f32.mrb[4].mxu1 }
 0x45a   : > { %v537_v9 = vadd.f32 %v536_v8, %v2117_v20  ;;  %v1667_v10 = vpop.f32.mrb[13].mxu0  ;;  %v1673_v12 = vpop.f32.mrb[5].mxu1 }
 0x45b   : > { %v488_v13 = vpop.f32.mrb[14].mxu0  ;;  %v539_v14 = vpop.f32.mrb[6].mxu1 }
 0x45c   : > { %v1668_v15 = vpop.f32.mrb[15].mxu0  ;;  %v1674_v17 = vpop.f32.mrb[7].mxu1  ;;  %v593_v18 = vsel %vm274_vm2, %v537_v9, -inf }
 0x45d   : > { %594 = vmax.xlane.f32.xlu1 %v593_v18 }
 0x461   : > { %v587_v21 = vpop.f32.mrb[16].mxu0 }
 0x462   : > { %v588_v22 = vadd.f32 %v587_v21, %v2117_v20  ;;  %v1679_v23 = vpop.f32.mrb[17].mxu0 }
 0x463   : > { %v590_v24 = vpop.f32.mrb[18].mxu0 }
 0x464   : > { %v1680_v25 = vpop.f32.mrb[19].mxu0  ;;  %v596_v26 = vsel %vm274_vm2, %v588_v22, -inf }
 0x465   : > { %597 = vmax.xlane.f32.xlu0 %v596_v26 }
 0x46e   : > { %617 = vrot.lane.b32.xlu1 %v2092_v7, %s1973_s22 }
 0x472   : > { %715 = vrot.lane.b32.xlu1 %v2092_v7, %s1974_s23 }
 0x47b   : > { %665 = vrot.lane.b32.xlu0 %v2095_v11, %s1973_s22  ;;  %s1586_s22 = sshll.u32 %s2032_s19, 8  ;;  %s2318_s19 = scalar_lea.sflag [#allocation3], %s189_s14 }
 0x47f   : > { %713 = vrot.lane.b32.xlu0 %v2100_v16, %s1975_s27 }
 0x4ea   : > { %v595_v27 = vpop.xlane.xlu1 %594 }
 0x4eb   : > { %v599_v28 = vsub.f32 %v537_v9, %v595_v27 }
 0x4ed   : > { %v601_v29 = vmul.f32 1.442695, %v599_v28 }
 0x4ee   : > { %v618_v30 = vpop.permute.xlu1 %617 }
 0x4ef   : > { %1871 = vpow2.f32 %v601_v29  ;;  %v623_v31 = vsel %vm399_vm3, %v618_v30, 0 }
 0x4f0   : > { %1682 = vmatpush3.bf16.msra.mxu1 %v623_v31 }
 0x4f1   : > { %1693 = vmatprep.subr.bf16.mxu1 %v1967_v1 }
 0x4f2   : > { %v598_v32 = vpop.xlane.xlu0 %597  ;;  %v716_v41 = vpop.permute.xlu1 %715 }
 0x4f3   : > { %v600_v33 = vsub.f32 %v588_v22, %v598_v32  ;;  %v721_v47 = vsel %vm274_vm2, %v716_v41, 0 }
 0x4f5   : > { %v603_v34 = vmul.f32 1.442695, %v600_v33 }
 0x4f6   : > { %v666_v35 = vpop.permute.xlu0 %665 }
 0x4f7   : > { %1873 = vpow2.f32 %v603_v34  ;;  %v671_v36 = vsel %vm399_vm3, %v666_v35, 0 }
 0x4f8   : > { %1688 = vmatpush3.bf16.msra.mxu0 %v671_v36 }
 0x4f9   : > { %v1872_v37 = vpop.eup %1871  ;;  %1699 = vmatprep.subr.bf16.mxu0 %v1967_v1 }
 0x4fa   : > { %v605_v38 = vsel %vm274_vm2, %v1872_v37, 0.0  ;;  %v714_v52 = vpop.permute.xlu0 %713 }
 0x4fb   : > { %606 = vadd.xlane.f32.xlu1 %v605_v38 }
 0x501   : > { %v1874_v39 = vpop.eup %1873 }
 0x502   : > { %v608_v40 = vsel %vm274_vm2, %v1874_v39, 0.0 }
 0x503   : > { %609 = vadd.xlane.f32.xlu1 %v608_v40 }
 0x514   : > { %765 = vrot.lane.b32.xlu1 %v2095_v11, %s1974_s23  ;;  %s191_s23 = scalar_lea.vmem [#allocation2], %s1547_s20 }
 0x518   : > { %763 = vrot.lane.b32.xlu1 %v2108_v19, %s1975_s27  ;;  %s1481_s27 = sshll.u32 %s191_s23, 4  ;;  %s2315_s27 = int_to_ptr.vmem [resolvable:$true] %s1481_s27 }
 0x588   : > { %v607_v42 = vpop.xlane.xlu1 %606 }
 0x589   : > { %1875 = vrcp.f32 %v607_v42 }
 0x590   : > { %v610_v43 = vpop.xlane.xlu1 %609 }
 0x591   : > { %1877 = vrcp.f32 %v610_v43 }
 0x593   : > { %v1876_v44 = vpop.eup %1875 }
 0x594   : > { %v613_v45 = vmul.f32 %v1876_v44, %v1872_v37  ;;  %v766_v50 = vpop.permute.xlu1 %765 }
 0x595   : > { %v771_v53 = vsel %vm274_vm2, %v766_v50, 0 }
 0x596   : > { %v615_v46 = vpack.c.bf16 %v613_v45, %v613_v45 }
 0x598   : > { %1684 = vmatmul.mubr.msk.bf16.vlgmr.msra.gmra.mrb[8].mxu1 %vm274_vm2, %v615_v46  ;;  %v764_v54 = vpop.permute.xlu1 %763 }
 0x599   : > { %1694 = vmatpush3.bf16.xpose.msra.mxu1 %v721_v47  ;;  %1695 = vmatprep.mubr.msk.bf16.mxu1 %vm1968_vm0, %v1967_v1 }
 0x59a   : > { %1705 = vmatprep.subr.bf16.mxu1 %v1967_v1 }
 0x59b   : > { %v1878_v48 = vpop.eup %1877 }
 0x59c   : > { %v614_v49 = vmul.f32 %v1878_v48, %v1874_v39 }
 0x59e   : > { %v616_v51 = vpack.c.bf16 %v614_v49, %v614_v49 }
 0x5a0   : > { %1690 = vmatmul.mubr.msk.bf16.vlgmr.msra.gmra.mrb[20].mxu0 %vm274_vm2, %v616_v51  ;;  %1696 = vmatmul.mubr.msk.bf16.vlgmr.msra.gmra.mrb[12].mxu1 %vm274_vm2, %v714_v52 }
 0x5a1   : > { %1700 = vmatpush3.bf16.xpose.msra.mxu0 %v771_v53  ;;  %1701 = vmatprep.mubr.msk.bf16.mxu0 %vm1968_vm0, %v1967_v1 }
 0x5a2   : > { %1711 = vmatprep.subr.bf16.mxu0 %v1967_v1  ;;  %1707 = vmatprep.mubr.msk.bf16.mxu1 %vm1968_vm0, %v1967_v1 }
 0x5a8   : > { %1702 = vmatmul.mubr.msk.bf16.vlgmr.msra.gmra.mrb[24].mxu0 %vm274_vm2, %v764_v54 }
 0x5a9   : > { %1713 = vmatprep.mubr.msk.bf16.mxu0 %vm1968_vm0, %v1967_v1 }
 0x66b   : > { %v2187_v55 = vpop.f32.mrb[8].mxu1 }
 0x66c   : > { %v1685_v56 = vpop.f32.mrb[9].mxu1 }
 0x66d   : > { %v662_v57 = vpop.f32.mrb[10].mxu1 }
 0x66e   : > { %v1686_v58 = vpop.f32.mrb[11].mxu1 }
 0x673   : > { %v2189_v59 = vpop.f32.mrb[20].mxu0  ;;  %v757_v60 = vpop.f32.mrb[12].mxu1 }
 0x674   : > { %v1834_v62 = vpack.i.bf16 %v2189_v59, %v2187_v55  ;;  %v758_v63 = vadd.f32 %v757_v60, %v2117_v20  ;;  %v1691_v5 = vpop.f32.mrb[21].mxu0  ;;  %v1697_v8 = vpop.f32.mrb[13].mxu1 }
 0x675   : > { %v710_v9 = vpop.f32.mrb[22].mxu0  ;;  %v760_v10 = vpop.f32.mrb[14].mxu1 }
 0x676   : > { %v1692_v12 = vpop.f32.mrb[23].mxu0  ;;  %v1698_v13 = vpop.f32.mrb[15].mxu1  ;;  %v813_v14 = vsel %vm274_vm2, %v758_v63, -inf }
 0x677   : > { %814 = vmax.xlane.f32.xlu0 %v813_v14 }
 0x67b   : > { %v807_v15 = vpop.f32.mrb[24].mxu0 }
 0x67c   : > { %v808_v17 = vadd.f32 %v807_v15, %v2117_v20  ;;  %v1703_v18 = vpop.f32.mrb[25].mxu0 }
 0x67d   : > { %v810_v21 = vpop.f32.mrb[26].mxu0 }
 0x67e   : > { %v1704_v22 = vpop.f32.mrb[27].mxu0  ;;  %v816_v23 = vsel %vm274_vm2, %v808_v17, -inf }
 0x67f   : > { %817 = vmax.xlane.f32.xlu1 %v816_v23 }
 0x690   : > { %837 = vrot.lane.b32.xlu1 %v2092_v7, %s1976_s28 }
 0x694   : > { %935 = vrot.lane.b32.xlu1 %v2092_v7, %s1977_s29 }
 0x698   : > { %985 = vrot.lane.b32.xlu1 %v2095_v11, %s1977_s29 }
 0x69c   : > { %983 = vrot.lane.b32.xlu1 %v2108_v19, %s1978_s30 }
 0x704   : > { %v815_v24 = vpop.xlane.xlu0 %814 }
 0x705   : > { %v819_v25 = vsub.f32 %v758_v63, %v815_v24 }
 0x707   : > { %v821_v26 = vmul.f32 1.442695, %v819_v25 }
 0x709   : > { %1879 = vpow2.f32 %v821_v26 }
 0x70c   : > { %v818_v27 = vpop.xlane.xlu1 %817 }
 0x70d   : > { %v820_v28 = vsub.f32 %v808_v17, %v818_v27 }
 0x70f   : > { %v823_v29 = vmul.f32 1.442695, %v820_v28 }
 0x710   : > { %v838_v30 = vpop.permute.xlu1 %837 }
 0x711   : > { %1881 = vpow2.f32 %v823_v29  ;;  %v843_v31 = vsel %vm399_vm3, %v838_v30, 0 }
 0x712   : > { %1706 = vmatpush3.bf16.msra.mxu1 %v843_v31 }
 0x713   : > { %v1880_v32 = vpop.eup %1879  ;;  %1717 = vmatprep.subr.bf16.mxu1 %v1967_v1 }
 0x714   : > { %v825_v33 = vsel %vm274_vm2, %v1880_v32, 0.0  ;;  %v936_v40 = vpop.permute.xlu1 %935 }
 0x715   : > { %826 = vadd.xlane.f32.xlu0 %v825_v33  ;;  %v941_v43 = vsel %vm274_vm2, %v936_v40, 0 }
 0x718   : > { %v986_v45 = vpop.permute.xlu1 %985 }
 0x719   : > { %v991_v48 = vsel %vm274_vm2, %v986_v45, 0 }
 0x71b   : > { %v1882_v34 = vpop.eup %1881 }
 0x71c   : > { %v828_v19 = vsel %vm274_vm2, %v1882_v34, 0.0  ;;  %v984_v49 = vpop.permute.xlu1 %983 }
 0x71d   : > { %829 = vadd.xlane.f32.xlu0 %v828_v19 }
 0x733   : > { %885 = vrot.lane.b32.xlu0 %v2095_v11, %s1976_s28 }
 0x737   : > { %933 = vrot.lane.b32.xlu0 %v2100_v16, %s1978_s30  ;;  %s2312_s30 = scalar_lea.hbm %s2364_s4, %s1586_s22 }
 0x7a2   : > { %v827_v35 = vpop.xlane.xlu0 %826 }
 0x7a3   : > { %1883 = vrcp.f32 %v827_v35  ;;  %v1851_v35 = vld [vmem:[%s2361_s1 + $0x4] ss:$8 sps:$4 sm:$0xff]  }
 0x7aa   : > { %v830_v36 = vpop.xlane.xlu0 %829 }
 0x7ab   : > { %1885 = vrcp.f32 %v830_v36 }
 0x7ad   : > { %v1884_v37 = vpop.eup %1883 }
 0x7ae   : > { %v833_v38 = vmul.f32 %v1884_v37, %v1880_v32  ;;  %v886_v39 = vpop.permute.xlu0 %885  ;;  %v1854_v37 = vld [vmem:[%s2361_s1 + $0x14] ss:$8 sps:$4 sm:$0xff]  }
 0x7af   : > { %v891_v41 = vsel %vm399_vm3, %v886_v39, 0 }
 0x7b0   : > { %1712 = vmatpush3.bf16.msra.mxu0 %v891_v41  ;;  %v835_v42 = vpack.c.bf16 %v833_v38, %v833_v38 }
 0x7b1   : > { %1723 = vmatprep.subr.bf16.mxu0 %v1967_v1 }
 0x7b2   : > { %1708 = vmatmul.mubr.msk.bf16.vlgmr.msra.gmra.mrb[16].mxu1 %vm274_vm2, %v835_v42  ;;  %v934_v47 = vpop.permute.xlu0 %933 }
 0x7b3   : > { %1718 = vmatpush3.bf16.xpose.msra.mxu1 %v941_v43  ;;  %1719 = vmatprep.mubr.msk.bf16.mxu1 %vm1968_vm0, %v1967_v1 }
 0x7b4   : > { %1729 = vmatprep.subr.bf16.mxu1 %v1967_v1 }
 0x7b5   : > { %v1886_v16 = vpop.eup %1885 }
 0x7b6   : > { %v834_v44 = vmul.f32 %v1886_v16, %v1882_v34 }
 0x7b8   : > { %v836_v46 = vpack.c.bf16 %v834_v44, %v834_v44 }
 0x7ba   : > { %1714 = vmatmul.mubr.msk.bf16.vlgmr.msra.gmra.mrb[28].mxu0 %vm274_vm2, %v836_v46  ;;  %1720 = vmatmul.mubr.msk.bf16.vlgmr.msra.gmra.mrb[20].mxu1 %vm274_vm2, %v934_v47 }
 0x7bb   : > { %1724 = vmatpush3.bf16.xpose.msra.mxu0 %v991_v48  ;;  %1725 = vmatprep.mubr.msk.bf16.mxu0 %vm1968_vm0, %v1967_v1 }
 0x7bc   : > { %1735 = vmatprep.subr.bf16.mxu0 %v1967_v1  ;;  %1731 = vmatprep.mubr.msk.bf16.mxu1 %vm1968_vm0, %v1967_v1 }
 0x7c2   : > { %1726 = vmatmul.mubr.msk.bf16.vlgmr.msra.gmra.mrb[32].mxu0 %vm274_vm2, %v984_v49 }
 0x7c3   : > { %1737 = vmatprep.mubr.msk.bf16.mxu0 %vm1968_vm0, %v1967_v1 }
 0x885   : > { %v879_v50 = vpop.f32.mrb[16].mxu1 }
 0x886   : > { %v1709_v51 = vpop.f32.mrb[17].mxu1 }
 0x887   : > { %v882_v52 = vpop.f32.mrb[18].mxu1 }
 0x888   : > { %v1710_v53 = vpop.f32.mrb[19].mxu1 }
 0x88d   : > { %v927_v54 = vpop.f32.mrb[28].mxu0  ;;  %v977_v56 = vpop.f32.mrb[20].mxu1 }
 0x88e   : > { %v1839_v57 = vpack.i.bf16 %v927_v54, %v879_v50  ;;  %v978_v58 = vadd.f32 %v977_v56, %v2117_v20  ;;  %v1715_v60 = vpop.f32.mrb[29].mxu0  ;;  %v1721_v63 = vpop.f32.mrb[21].mxu1 }
 0x88f   : > { %v930_v5 = vpop.f32.mrb[30].mxu0  ;;  %v980_v8 = vpop.f32.mrb[22].mxu1 }
 0x890   : > { %v1716_v9 = vpop.f32.mrb[31].mxu0  ;;  %v1722_v10 = vpop.f32.mrb[23].mxu1  ;;  %v1033_v12 = vsel %vm274_vm2, %v978_v58, -inf }
 0x891   : > { %1034 = vmax.xlane.f32.xlu0 %v1033_v12 }
 0x895   : > { %v1027_v13 = vpop.f32.mrb[32].mxu0 }
 0x896   : > { %v1028_v14 = vadd.f32 %v1027_v13, %v2117_v20  ;;  %v1727_v15 = vpop.f32.mrb[33].mxu0 }
 0x897   : > { %v1030_v17 = vpop.f32.mrb[34].mxu0 }
 0x898   : > { %v1728_v18 = vpop.f32.mrb[35].mxu0  ;;  %v1036_v21 = vsel %vm274_vm2, %v1028_v14, -inf }
 0x899   : > { %1037 = vmax.xlane.f32.xlu1 %v1036_v21 }
 0x8aa   : > { %1057 = vrot.lane.b32.xlu1 %v2092_v7, %s1979_s5 }
 0x8ae   : > { %1186 = vrot.lane.b32.xlu1 %v2062_v0, %s1980_s6 }
 0x8b2   : > { %1835 = vrot.lane.b32.xlu1 %v1834_v62, %s1981_s7 }
 0x91e   : > { %v1035_v22 = vpop.xlane.xlu0 %1034 }
 0x91f   : > { %v1039_v20 = vsub.f32 %v978_v58, %v1035_v22 }
 0x921   : > { %v1041_v23 = vmul.f32 1.442695, %v1039_v20 }
 0x923   : > { %1887 = vpow2.f32 %v1041_v23  ;;  %v1857_v23 = vld [vmem:[%s2362_s2 + $0x10] sm:$0xff]  }
 0x926   : > { %v1038_v24 = vpop.xlane.xlu1 %1037 }
 0x927   : > { %v1040_v25 = vsub.f32 %v1028_v14, %v1038_v24  ;;  %v1858_v24 = vld [vmem:[%s2362_s2 + $0x18] sm:$0xff]  }
 0x929   : > { %v1043_v26 = vmul.f32 1.442695, %v1040_v25  ;;  %v1859_v25 = vld [vmem:[%s2362_s2 + $0x20] sm:$0xff]  }
 0x92a   : > { %v1058_v27 = vpop.permute.xlu1 %1057 }
 0x92b   : > { %1889 = vpow2.f32 %v1043_v26  ;;  %v1063_v7 = vsel %vm399_vm3, %v1058_v27, 0  ;;  %v1860_v26 = vld [vmem:[%s2362_s2 + $0x28] sm:$0xff]  }
 0x92c   : > { %1730 = vmatpush3.bf16.msra.mxu1 %v1063_v7 }
 0x92d   : > { %v1888_v28 = vpop.eup %1887  ;;  %1741 = vmatprep.subr.bf16.mxu1 %v1967_v1 }
 0x92e   : > { %v1045_v0 = vsel %vm274_vm2, %v1888_v28, 0.0  ;;  %v1187_v19 = vpop.permute.xlu1 %1186 }
 0x92f   : > { %1046 = vadd.xlane.f32.xlu0 %v1045_v0 }
 0x932   : > { %v1836_v48 = vpop.permute.xlu1 %1835 }
 0x933   : > { %v1838_v49 = vunpack.i.h.bf16 %v1836_v48  ;;  %v1837_v50 = vunpack.i.l.bf16 %v1836_v48 }
 0x935   : > { %v1890_v55 = vpop.eup %1889  ;;  %v1178_v54 = vsel %vm274_vm2, %v2153_v6, %v1838_v49  ;;  %v1177_v56 = vsel %vm274_vm2, %v2151_v61, %v1837_v50 }
 0x936   : > { %v1048_v59 = vsel %vm274_vm2, %v1890_v55, 0.0 }
 0x937   : > { %1049 = vadd.xlane.f32.xlu0 %v1048_v59 }
 0x94d   : > { %1105 = vrot.lane.b32.xlu0 %v2095_v11, %s1979_s5  ;;  %s1903_s5 = scalar_lea.vmem %s2315_s27, 256 }
 0x94e   : > { %p1904_p11 = scmp.ne.s32.totalorder %s2315_s27, %s1903_s5 }
 0x950   : > { %p1905_p12 = pnand %p1904_p11, %p2049_p5 }
 0x951   : > { %1840 = vrot.lane.b32.xlu0 %v1839_v57, %s1982_s8 }
 0x952   : > { %p1906_p13 = pneg %p1905_p12 }
 0x955   : > { %1188 = vrot.lane.b32.xlu0 %v2072_v2, %s1980_s6  ;;  %s1984_s6 = smov [#allocation2]  }
 0x956   : > { %s1907_s8 = sshll.u32 %s1984_s6, 4  ;;  %s1908_s8 = int_to_ptr.vmem [resolvable:$false] %s1907_s8 }
 0x957   : > { %s1909_s9 = scalar_lea.vmem %s1908_s8, 512  ;;  %p1910_p0 = scmp.lt.s32.totalorder %s2315_s27, %s1908_s8 }
 0x958   : > { %p1911_p1 = scmp.lt.s32.totalorder %s1909_s9, %s1903_s5 }
 0x95a   : > { %p1912_p2 = por %p1911_p1, %p1910_p0 }
 0x95c   : > { %p1913_p3 = pnand %p1912_p2, %p1906_p13 }
 0x9bc   : > { %v1047_v62 = vpop.xlane.xlu0 %1046 }
 0x9bd   : > { %1891 = vrcp.f32 %v1047_v62 }
 0x9c4   : > { %v1050_v29 = vpop.xlane.xlu0 %1049 }
 0x9c5   : > { %1893 = vrcp.f32 %v1050_v29 }
 0x9c7   : > { %v1892_v30 = vpop.eup %1891 }
 0x9c8   : > { %v1053_v31 = vmul.f32 %v1892_v30, %v1888_v28  ;;  %v1106_v32 = vpop.permute.xlu0 %1105 }
 0x9c9   : > { %v1111_v33 = vsel %vm399_vm3, %v1106_v32, 0 }
 0x9ca   : > { %1736 = vmatpush3.bf16.msra.mxu0 %v1111_v33  ;;  %v1055_v34 = vpack.c.bf16 %v1053_v31, %v1053_v31 }
 0x9cb   : > { %1749 = vmatprep.subr.bf16.mxu0 %v1967_v1 }
 0x9cc   : > { %1732 = vmatmul.mubr.msk.bf16.vlgmr.msra.gmra.mrb[24].mxu1 %vm274_vm2, %v1055_v34  ;;  %v1841_v38 = vpop.permute.xlu0 %1840 }
 0x9cd   : > { %1742 = vmatpush3.bf16.msra.mxu1 %v1187_v19  ;;  %1745 = vmatprep.mubr.msk.bf16.mxu1 %vm1968_vm0, %v1967_v1  ;;  %v1843_v51 = vunpack.i.h.bf16 %v1841_v38  ;;  %v1842_v52 = vunpack.i.l.bf16 %v1841_v38 }
 0x9ce   : > { %1743 = vmatprep.subr.bf16.mxu1 %v1967_v1 }
 0x9cf   : > { %v1894_v2 = vpop.eup %1893  ;;  %v1180_v60 = vsel %vm1179_vm4, %v1177_v56, %v1842_v52  ;;  %v1181_v63 = vsel %vm1179_vm4, %v1178_v54, %v1843_v51 }
 0x9d0   : > { %v1054_v11 = vmul.f32 %v1894_v2, %v1890_v55  ;;  %v1189_v40 = vpop.permute.xlu0 %1188 }
 0x9d1   : > { %1744 = vmatpush3.bf16.msra.mxu1 %v1189_v40 }
 0x9d2   : > { %v1056_v36 = vpack.c.bf16 %v1054_v11, %v1054_v11  ;;  %1757 = vmatprep.subr.bf16.mxu1 %v1967_v1 }
 0x9d4   : > { %1738 = vmatmul.mubr.msk.bf16.vlgmr.msra.gmra.mrb[36].mxu0 %vm274_vm2, %v1056_v36 }
 0x9d5   : > { %1750 = vmatpush3.bf16.msra.mxu0 %v1851_v35  ;;  %1753 = vmatprep.mubr.msk.bf16.mxu0 %vm1968_vm0, %v1967_v1 }
 0x9d6   : > { %1751 = vmatprep.subr.bf16.mxu0 %v1967_v1 }
 0x9d9   : > { %1752 = vmatpush3.bf16.msra.mxu0 %v1854_v37 }
 0xa9f   : > { %v1099_v39 = vpop.f32.mrb[24].mxu1 }
 0xaa0   : > { %v1733_v41 = vpop.f32.mrb[25].mxu1 }
 0xaa1   : > { %v1102_v42 = vpop.f32.mrb[26].mxu1 }
 0xaa2   : > { %v1734_v43 = vpop.f32.mrb[27].mxu1  ;;  %v1861_v42 = vld [vmem:[%s2362_s2 + $0x30] sm:$0xff]  }
 0xaa3   : > { %v1862_v43 = vld [vmem:[%s2362_s2 + $0x38] sm:$0xff]  }
 0xaa7   : > { %v1147_v16 = vpop.f32.mrb[36].mxu0 }
 0xaa8   : > { %v1844_v44 = vpack.i.bf16 %v1147_v16, %v1099_v39  ;;  %v1739_v45 = vpop.f32.mrb[37].mxu0 }
 0xaa9   : > { %v1150_v46 = vpop.f32.mrb[38].mxu0 }
 0xaaa   : > { %1845 = vrot.lane.b32.xlu1 %v1844_v44, %s1983_s13  ;;  %v1740_v47 = vpop.f32.mrb[39].mxu0 }
 0xb1c   : > { %v1846_v53 = vpop.permute.xlu1 %1845 }
 0xb1d   : > { %v1848_v57 = vunpack.i.h.bf16 %v1846_v53  ;;  %v1847_v58 = vunpack.i.l.bf16 %v1846_v53 }
 0xb1f   : > { %v1184_v5 = vsel %vm1182_vm5, %v1181_v63, %v1848_v57  ;;  %v1183_v8 = vsel %vm1182_vm5, %v1180_v60, %v1847_v58 }
 0xb20   : > { %v1185_v9 = vpack.c.bf16 %v1184_v5, %v1183_v8 }
 0xb22   : > { %1746 = vmatmul.mubr.msk.bf16.vlgmr.msra.gmra.mrb[28].mxu1 %vm219_vm1, %v1185_v9 }
 0xb23   : > { %1773 = vmatprep.mubr.msk.bf16.mxu1 %vm1968_vm0, %v1967_v1 }
 0xbf5   : > { %v1229_v10 = vpop.f32.mrb[28].mxu1 }
 0xbf6   : > { %v1236_v12 = vadd.f32 %v1229_v10, %v2083_v3  ;;  %v1747_v13 = vpop.f32.mrb[29].mxu1  ;;  %v1855_v3 = vld [vmem:[%s2362_s2] sm:$0xff]  }
 0xbf7   : > { %v1232_v6 = vpop.f32.mrb[30].mxu1  ;;  %1758 = vmatpush3.bf16.msra.mxu1 %v1855_v3 }
 0xbf8   : > { %v1237_v14 = vadd.f32 %v1232_v6, %v2085_v4  ;;  %v1748_v61 = vpop.f32.mrb[31].mxu1  ;;  %v1238_v15 = vsel %vm219_vm1, %v1236_v12, 0.0  ;;  %v1244_v21 = vmul.f32 %v1236_v12, %v1236_v12  ;;  %v1856_v4 = vld [vmem:[%s2362_s2 + $0x8] sm:$0xff]   ;;  %1759 = vmatprep.subr.bf16.mxu1 %v1967_v1 }
 0xbf9   : > { %1239 = vadd.xlane.f32.xlu1 %v1238_v15 }
 0xbfa   : > { %v1241_v17 = vsel %vm219_vm1, %v1237_v14, 0.0  ;;  %v1245_v18 = vmul.f32 %v1237_v14, %v1237_v14  ;;  %v1246_v20 = vsel %vm219_vm1, %v1244_v21, 0.0 }
 0xbfb   : > { %1242 = vadd.xlane.f32.xlu0 %v1241_v17  ;;  %1760 = vmatpush3.bf16.msra.mxu1 %v1856_v4 }
 0xbfc   : > { %v1249_v22 = vsel %vm219_vm1, %v1245_v18, 0.0  ;;  %1761 = vmatprep.subr.bf16.mxu1 %v1967_v1 }
 0xbfd   : > { %1250 = vadd.xlane.f32.xlu1 %v1249_v22 }
 0xbff   : > { %1247 = vadd.xlane.f32.xlu0 %v1246_v20  ;;  %1762 = vmatpush3.bf16.msra.mxu1 %v1857_v23 }
 0xc00   : > { %1763 = vmatprep.subr.bf16.mxu1 %v1967_v1 }
 0xc03   : > { %1764 = vmatpush3.bf16.msra.mxu1 %v1858_v24 }
 0xc04   : > { %1765 = vmatprep.subr.bf16.mxu1 %v1967_v1 }
 0xc07   : > { %1766 = vmatpush3.bf16.msra.mxu1 %v1859_v25 }
 0xc08   : > { %1767 = vmatprep.subr.bf16.mxu1 %v1967_v1 }
 0xc0b   : > { %1768 = vmatpush3.bf16.msra.mxu1 %v1860_v26 }
 0xc0c   : > { %1769 = vmatprep.subr.bf16.mxu1 %v1967_v1 }
 0xc0f   : > { %1770 = vmatpush3.bf16.msra.mxu1 %v1861_v42 }
 0xc10   : > { %1771 = vmatprep.subr.bf16.mxu1 %v1967_v1 }
 0xc13   : > { %1772 = vmatpush3.bf16.msra.mxu1 %v1862_v43 }
 0xc86   : > { %v1240_v27 = vpop.xlane.xlu1 %1239 }
 0xc87   : > { %v1252_v28 = vmul.f32 0.03125, %v1240_v27 }
 0xc88   : > { %v1243_v7 = vpop.xlane.xlu0 %1242 }
 0xc89   : > { %v1253_v0 = vmul.f32 0.03125, %v1243_v7  ;;  %v1256_v30 = vmul.f32 %v1252_v28, %v1252_v28  ;;  %v1262_v36 = vsub.f32 %v1236_v12, %v1252_v28 }
 0xc8a   : > { %v1251_v55 = vpop.xlane.xlu1 %1250 }
 0xc8b   : > { %v1257_v59 = vmul.f32 %v1253_v0, %v1253_v0  ;;  %v1255_v62 = vmul.f32 0.03125, %v1251_v55  ;;  %v1263_v37 = vsub.f32 %v1237_v14, %v1253_v0 }
 0xc8c   : > { %v1248_v29 = vpop.xlane.xlu0 %1247 }
 0xc8d   : > { %v1259_v31 = vsub.f32 %v1255_v62, %v1257_v59  ;;  %v1254_v32 = vmul.f32 0.03125, %v1248_v29 }
 0xc8f   : > { %v1261_v33 = vmax.f32 %v1259_v31, 0.0  ;;  %v1258_v34 = vsub.f32 %v1254_v32, %v1256_v30 }
 0xc91   : > { %v1265_v19 = vadd.f32 1e-05, %v1261_v33  ;;  %v1260_v2 = vmax.f32 %v1258_v34, 0.0 }
 0xc93   : > { %1895 = vrsqrt.f32 %v1265_v19  ;;  %v1264_v11 = vadd.f32 1e-05, %v1260_v2 }
 0xc95   : > { %1897 = vrsqrt.f32 %v1264_v11 }
 0xc9d   : > { %v1896_v35 = vpop.eup %1895 }
 0xc9e   : > { %v1269_v40 = vmul.f32 %v1896_v35, %v1263_v37 }
 0xc9f   : > { %v1898_v38 = vpop.eup %1897 }
 0xca0   : > { %v1268_v39 = vmul.f32 %v1898_v38, %v1262_v36 }
 0xca2   : > { %v1270_v41 = vpack.c.bf16 %v1269_v40, %v1268_v39 }
 0xca4   : > { %1754 = vmatmul.mubr.msk.bf16.vlgmr.msra.gmra.mrb[40].mxu0 %vm219_vm1, %v1270_v41 }
 0xd77   : > { %v1316_v16 = vpop.f32.mrb[40].mxu0 }
 0xd78   : > { %v1755_v44 = vpop.f32.mrb[41].mxu0  ;;  %v1323_v46 = vmax.f32 %v1316_v16, 0.0 }
 0xd79   : > { %v1319_v45 = vpop.f32.mrb[42].mxu0 }
 0xd7a   : > { %v1324_v47 = vmax.f32 %v1319_v45, 0.0  ;;  %v1756_v48 = vpop.f32.mrb[43].mxu0 }
 0xd7c   : > { %v1325_v49 = vpack.c.bf16 %v1324_v47, %v1323_v46 }
 0xd7e   : > { %1774 = vmatmul.mubr.bf16.vlgmr.msra.gmra.mrb[32].mxu1 %v1325_v49 }
 0xe51   : > { %v1424_v50 = vpop.f32.mrb[32].mxu1 }
 0xe52   : > { %v1431_v51 = vadd.f32 %v1424_v50, %v1268_v39  ;;  %v1775_v52 = vpop.f32.mrb[33].mxu1 }
 0xe53   : > { %v1427_v53 = vpop.f32.mrb[34].mxu1 }
 0xe54   : > { %v1432_v54 = vadd.f32 %v1427_v53, %v1269_v40  ;;  %v1776_v56 = vpop.f32.mrb[35].mxu1  ;;  %v1433_v1 = vsel %vm219_vm1, %v1431_v51, 0.0  ;;  %v1439_v57 = vmul.f32 %v1431_v51, %v1431_v51 }
 0xe55   : > { %1434 = vadd.xlane.f32.xlu0 %v1433_v1 }
 0xe56   : > { %v1436_v58 = vsel %vm219_vm1, %v1432_v54, 0.0  ;;  %v1440_v60 = vmul.f32 %v1432_v54, %v1432_v54  ;;  %v1441_v63 = vsel %vm219_vm1, %v1439_v57, 0.0 }
 0xe57   : > { %1437 = vadd.xlane.f32.xlu1 %v1436_v58 }
 0xe58   : > { %v1444_v5 = vsel %vm219_vm1, %v1440_v60, 0.0 }
 0xe59   : > { %1442 = vadd.xlane.f32.xlu0 %v1441_v63 }
 0xe5b   : > { %1445 = vadd.xlane.f32.xlu1 %v1444_v5 }
 0xee2   : > { %v1435_v8 = vpop.xlane.xlu0 %1434 }
 0xee3   : > { %v1447_v9 = vmul.f32 0.03125, %v1435_v8 }
 0xee4   : > { %v1438_v10 = vpop.xlane.xlu1 %1437 }
 0xee5   : > { %v1448_v12 = vmul.f32 0.03125, %v1438_v10  ;;  %v1451_v6 = vmul.f32 %v1447_v9, %v1447_v9  ;;  %v1457_v23 = vsub.f32 %v1431_v51, %v1447_v9 }
 0xee6   : > { %v1443_v13 = vpop.xlane.xlu0 %1442 }
 0xee7   : > { %v1449_v14 = vmul.f32 0.03125, %v1443_v13  ;;  %v1452_v15 = vmul.f32 %v1448_v12, %v1448_v12  ;;  %v1458_v25 = vsub.f32 %v1432_v54, %v1448_v12 }
 0xee8   : > { %v1446_v61 = vpop.xlane.xlu1 %1445 }
 0xee9   : > { %v1453_v17 = vsub.f32 %v1449_v14, %v1451_v6  ;;  %v1450_v18 = vmul.f32 0.03125, %v1446_v61 }
 0xeeb   : > { %v1455_v21 = vmax.f32 %v1453_v17, 0.0  ;;  %v1454_v22 = vsub.f32 %v1450_v18, %v1452_v15 }
 0xeed   : > { %v1459_v20 = vadd.f32 1e-05, %v1455_v21  ;;  %v1456_v3 = vmax.f32 %v1454_v22, 0.0 }
 0xeef   : > { %1899 = vrsqrt.f32 %v1459_v20  ;;  %v1460_v4 = vadd.f32 1e-05, %v1456_v3 }
 0xef1   : > { %1901 = vrsqrt.f32 %v1460_v4 }
 0xef9   : > { %v1900_v24 = vpop.eup %1899 }
 0xefa   : > { %v1463_v26 = vmul.f32 %v1900_v24, %v1457_v23 }
 0xefb   : > { %v1902_v27 = vpop.eup %1901 }
 0xefc   : > { %v1464_v7 = vmul.f32 %v1902_v27, %v1458_v25  ;;  %1465 = vst.msk [vmem:[%s191_s23] sm:$0xff] %vm219_vm1, %v1463_v26 }
 0xefe   : > { %1466 = vst.msk [vmem:[%s191_s23 + $0x8] sm:$0xff] %vm219_vm1, %v1464_v7 }
 0xeff   : > { %1916 = shalt.err (!%p1913_p3)
}
 0xf00   : > { %s1917_s10 = scalar_lea.hbm %s2312_s30, 256  ;;  %s1921_s13 = scalar_lea.hbm %s2364_s4, 512 }
 0xf01   : > { %p1918_p4 = scmp.ne.s32.totalorder %s2312_s30, %s1917_s10  ;;  %p1922_p9 = scmp.lt.u32.totalorder %s2312_s30, %s2364_s4 }
 0xf02   : > { %p1923_p10 = scmp.lt.u32.totalorder %s1921_s13, %s1917_s10  ;;  %p1925_p12 = scmp.lt.u32.totalorder %s1917_s10, %s2312_s30 }
 0xf03   : > { %p1919_p7 = pnand %p1918_p4, %p2049_p5 }
 0xf04   : > { %p1924_p11 = por %p1923_p10, %p1922_p9 }
 0xf05   : > { %p1920_p8 = pneg %p1919_p7 }
 0xf06   : > { %p1926_p13 = por %p1925_p12, %p1924_p11 }
 0xf08   : > { %p1927_p0 = pnand %p1926_p13, %p1920_p8 }
 0xf0a   : > { %1930 = shalt.err (!%p1927_p0)
}
 0xf0b   : > { %s1985_s22 = smov 128  }
 0xf0c   : > { %1777 = dma.vmem_to_hbm [thread:$0]  (%p2049_p5), %s2315_s27, 256, %s2312_s30, %s2318_s19, %s1985_s22, %s1985_s22, %s1981_s7  }
 0xf0d PF: > { %p1783_p1 = scmp.ge.s32.totalorder %s1965_s18, 2  ;;  %s1496_s23 = sand.u32 1, %s1953_s15  }
 0xf0e   : > { %s1497_s28 = scalar_lea.sflag [#allocation3], %s1496_s23 }
 0xf0f   : > { %p1780_p2 = pnand %p1783_p1, %p2053_p6 }
 0xf11   : > { %1948 = dma.done.wait (!%p1780_p2), %s1497_s28, 256  }
 0xf12   : > { %1950 = vsyncadd (!%p1780_p2), %s1497_s28, 4294967040  ;;  %p14_p3 = scmp.ge.s32.totalorder %s2036_s21, 4   ;;  %s2367_s15 = smov %s1957_s16 }
 0xf13   : > { %s2368_s16 = smov %s1961_s17  ;;  %s2369_s17 = smov %s2047_s24 }
 0xf14   : > { %s2370_s18 = smov %s2036_s21  ;;  %16 = sbr.rel (!%p14_p3) target bundleno = 3 (0x3), region = 71 }
 0xf1b   :  { %1502 = vsyncpa [#allocation3], 1 }
 0xf1c   :  { %1504 = vsyncpa [#allocation3 + $0x1], 1 }

</bundles_post_ra>
